<compile_context>
chip_gen: v7x
topology: tpu7x:2x2x1
jax: 0.10.0
libtpu: 0.0.40
codegen_flags: <defaults>
</compile_context>

<pallas_src>
import functools
import math

import jax
import jax.numpy as jnp
from jax.experimental import pallas as pl
from jax.experimental.pallas import tpu as pltpu


def _prune_kernel(src_ref, seq_ref, mask_ref, m_ref, out_ref):
    src = src_ref[...]       # [Bblk, D]
    seq = seq_ref[...]       # [Bblk, L, D]
    mask = mask_ref[...]     # [Bblk, L]  (0/1 float)
    fused = m_ref[...]       # [D, D] = (Wq^T @ Wk) / sqrt(D), precomputed

    # Fused q/k projection + scale for the whole batch block: one MXU matmul.
    s = jnp.dot(src, fused, preferred_element_type=jnp.float32)     # [Bblk, D]

    # scores[b, l] = s[b] . seq[b, l]  — VPU multiply + lane reduce; avoids
    # per-row degenerate (1-row) MXU passes and any in-kernel transposes.
    scores = jnp.sum(seq * s[:, None, :], axis=-1)                   # [Bblk, L]

    # masked_fill(mask, -1e10) followed by softmax over the key axis.
    scores = jnp.where(mask != 0, jnp.float32(-10000000000.0), scores)
    mmax = jnp.max(scores, axis=-1, keepdims=True)
    e = jnp.exp(scores - mmax)
    denom = jnp.sum(e, axis=-1, keepdims=True)
    attn = e * pl.reciprocal(denom, approx=True)                     # softmax

    # mask[attn < attn.mean(dim=-1, keepdim=True) / 5] = 1
    thr = jnp.mean(attn, axis=-1, keepdims=True) * jnp.float32(0.2)
    out_ref[...] = jnp.where(attn < thr, jnp.ones_like(mask), mask)


def prune_model_forward(src, seq, mask, wq, wk, *, block_b=None):
    """PruneModel.forward.

    src:  [B, D]   (self.src, already expanded by set_src)
    seq:  [B, L, D]
    mask: [B, L]   (0/1 float32)
    wq, wk: [D, D] torch nn.Linear weights (layout [out, in])
    Returns the updated mask, shape [B, L].
    """
    B, L, D = seq.shape

    # Algebraic fusion of both projections and the 1/sqrt(d_k) scale:
    #   scores = (src @ Wq^T) @ (seq @ Wk^T)^T / sqrt(D) = src @ M @ seq^T
    # with M = (Wq^T @ Wk) / sqrt(D).  Done once, outside the kernel.
    fused = (wq.T @ wk) / jnp.float32(math.sqrt(D))

    # One large batch block per grid step (amortizes ~0.35 us per-step cost).
    # Batch tiling only kicks in for big B (blocks of 256 keep VMEM modest and
    # give v7x's two TensorCores multiple 'parallel' steps).
    if block_b is None:
        block_b = B if B <= 256 else 256
    assert B % block_b == 0 and (block_b == B or block_b % 8 == 0)
    grid = (B // block_b,)

    out = pl.pallas_call(
        _prune_kernel,
        out_shape=jax.ShapeDtypeStruct((B, L), mask.dtype),
        grid=grid,
        in_specs=[
            pl.BlockSpec((block_b, D), lambda b: (b, 0)),        # src
            pl.BlockSpec((block_b, L, D), lambda b: (b, 0, 0)),  # seq
            pl.BlockSpec((block_b, L), lambda b: (b, 0)),        # mask
            pl.BlockSpec((D, D), lambda b: (0, 0)),              # fused weights
        ],
        out_specs=pl.BlockSpec((block_b, L), lambda b: (b, 0)),
        compiler_params=pltpu.CompilerParams(
            dimension_semantics=("parallel",)),
    )(src, seq, mask, fused)
    return out


def _reference(src, seq, mask, wq, wk):
    """Pure-JAX reference of the PruneModel forward (attn path only)."""
    D = seq.shape[-1]
    q = src @ wq.T                                    # [B, D]
    k = jnp.einsum('bld,ed->ble', seq, wk)            # [B, L, D]
    scores = jnp.einsum('bd,bld->bl', q, k) / math.sqrt(D)
    scores = jnp.where(mask != 0, -10000000000.0, scores)
    attn = jax.nn.softmax(scores, axis=-1)
    thr = attn.mean(axis=-1, keepdims=True) / 5.0
    return jnp.where(attn < thr, jnp.ones_like(mask), mask)


if __name__ == "__main__":
    # Small shapes consistent with the module.
    B0, n_ngh, L, D = 2, 2, 8, 32
    B = B0 * n_ngh

    key = jax.random.PRNGKey(0)
    k_src, k_seq, k_mask, k_wq, k_wk = jax.random.split(key, 5)

    # set_src(src, n_ngh): [B0, D] -> [B0*n_ngh, D]
    src0 = jax.random.normal(k_src, (B0, D), dtype=jnp.float32)
    src = jnp.repeat(src0[:, None, :], n_ngh, axis=1).reshape(B, D)

    seq = jax.random.normal(k_seq, (B, L, D), dtype=jnp.float32)
    mask = (jax.random.uniform(k_mask, (B, L)) < 0.3).astype(jnp.float32)

    # Parameter init matching nn.init.normal_(std=sqrt(2/(d_model+d_k))).
    std = math.sqrt(2.0 / (D + D))
    wq = std * jax.random.normal(k_wq, (D, D), dtype=jnp.float32)  # [out, in]
    wk = std * jax.random.normal(k_wk, (D, D), dtype=jnp.float32)  # [out, in]

    out = prune_model_forward(src, seq, mask, wq, wk)
    out = jax.block_until_ready(out)

    ref = _reference(src, seq, mask, wq, wk)
    assert out.shape == (B, L)
    assert jnp.allclose(out, ref, atol=1e-5), (out, ref)

    print("KERNEL_OK")
</pallas_src>

<mosaic_0001>
module attributes {stable_mosaic.version = 11 : i64} {
  func.func @_prune_kernel(%arg0: i32, %arg1: memref<4x32xf32, #tpu.memory_space<vmem>>, %arg2: memref<4x8x32xf32, #tpu.memory_space<vmem>>, %arg3: memref<4x8xf32, #tpu.memory_space<vmem>>, %arg4: memref<32x32xf32, #tpu.memory_space<vmem>>, %arg5: memref<4x8xf32, #tpu.memory_space<vmem>>) attributes {dimension_semantics = [#tpu.dimension_semantics<parallel>], iteration_bounds = array<i64: 1>, scalar_prefetch = 0 : i64, scratch_operands = 0 : i64, tpu.core_type = #tpu.core_type<tc>, window_params = [{transform_indices = @transform_0, window_bounds = array<i64: 4, 32>}, {transform_indices = @transform_1, window_bounds = array<i64: 4, 8, 32>}, {transform_indices = @transform_2, window_bounds = array<i64: 4, 8>}, {pipeline_mode = #tpu.pipeline_mode<synchronous>, transform_indices = @transform_3, window_bounds = array<i64: 32, 32>}, {transform_indices = @transform_4, window_bounds = array<i64: 4, 8>}]} {
    %c0 = arith.constant 0 : index
    %c0_0 = arith.constant 0 : index
    %0 = vector.load %arg1[%c0, %c0_0] : memref<4x32xf32, #tpu.memory_space<vmem>>, vector<4x32xf32>
    %c0_1 = arith.constant 0 : index
    %c0_2 = arith.constant 0 : index
    %c0_3 = arith.constant 0 : index
    %1 = vector.load %arg2[%c0_1, %c0_2, %c0_3] : memref<4x8x32xf32, #tpu.memory_space<vmem>>, vector<4x8x32xf32>
    %c0_4 = arith.constant 0 : index
    %c0_5 = arith.constant 0 : index
    %2 = vector.load %arg3[%c0_4, %c0_5] : memref<4x8xf32, #tpu.memory_space<vmem>>, vector<4x8xf32>
    %c0_6 = arith.constant 0 : index
    %c0_7 = arith.constant 0 : index
    %3 = vector.load %arg4[%c0_6, %c0_7] : memref<32x32xf32, #tpu.memory_space<vmem>>, vector<32x32xf32>
    %cst = arith.constant dense<0.000000e+00> : vector<4x32xf32>
    %4 = tpu.matmul %0, %3, %cst {dimension_numbers = #tpu.dot_dimension_numbers<[1], [0], [0], [1], [0, 0, 1, 1], [], []>} : vector<4x32xf32>, vector<32x32xf32>, vector<4x32xf32> -> vector<4x32xf32>
    %5 = vector.shape_cast %4 : vector<4x32xf32> to vector<4x1x32xf32>
    %6 = vector.broadcast %5 : vector<4x1x32xf32> to vector<4x8x32xf32>
    %7 = arith.mulf %1, %6 : vector<4x8x32xf32>
    %cst_8 = arith.constant dense<0.000000e+00> : vector<4x8xf32>
    %8 = vector.multi_reduction <add>, %7, %cst_8 [2] : vector<4x8x32xf32> to vector<4x8xf32>
    %cst_9 = arith.constant 0.000000e+00 : f32
    %9 = vector.broadcast %cst_9 : f32 to vector<4x8xf32>
    %10 = arith.cmpf one, %2, %9 : vector<4x8xf32>
    %cst_10 = arith.constant -1.000000e+10 : f32
    %11 = vector.broadcast %cst_10 : f32 to vector<4x8xf32>
    %12 = arith.select %10, %11, %8 : vector<4x8xi1>, vector<4x8xf32>
    %cst_11 = arith.constant dense<0xFF800000> : vector<4xf32>
    %13 = vector.multi_reduction <maximumf>, %12, %cst_11 [1] : vector<4x8xf32> to vector<4xf32>
    %14 = vector.shape_cast %13 : vector<4xf32> to vector<4x1xf32>
    %15 = vector.broadcast %14 : vector<4x1xf32> to vector<4x8xf32>
    %16 = arith.subf %12, %15 : vector<4x8xf32>
    %17 = math.exp %16 : vector<4x8xf32>
    %cst_12 = arith.constant dense<0.000000e+00> : vector<4xf32>
    %18 = vector.multi_reduction <add>, %17, %cst_12 [1] : vector<4x8xf32> to vector<4xf32>
    %19 = vector.shape_cast %18 : vector<4xf32> to vector<4x1xf32>
    %20 = tpu.reciprocal %19 {approx = true} : vector<4x1xf32> -> vector<4x1xf32>
    %21 = vector.broadcast %20 : vector<4x1xf32> to vector<4x8xf32>
    %22 = arith.mulf %17, %21 : vector<4x8xf32>
    %cst_13 = arith.constant dense<0.000000e+00> : vector<4xf32>
    %23 = vector.multi_reduction <add>, %22, %cst_13 [1] : vector<4x8xf32> to vector<4xf32>
    %24 = vector.shape_cast %23 : vector<4xf32> to vector<4x1xf32>
    %cst_14 = arith.constant 8.000000e+00 : f32
    %25 = vector.broadcast %cst_14 : f32 to vector<4x1xf32>
    %26 = arith.divf %24, %25 : vector<4x1xf32>
    %cst_15 = arith.constant 2.000000e-01 : f32
    %27 = vector.broadcast %cst_15 : f32 to vector<4x1xf32>
    %28 = arith.mulf %26, %27 : vector<4x1xf32>
    %29 = vector.broadcast %28 : vector<4x1xf32> to vector<4x8xf32>
    %30 = arith.cmpf olt, %22, %29 : vector<4x8xf32>
    %cst_16 = arith.constant 1.000000e+00 : f32
    %31 = vector.broadcast %cst_16 : f32 to vector<4x8xf32>
    %32 = arith.select %30, %31, %2 : vector<4x8xi1>, vector<4x8xf32>
    %c0_17 = arith.constant 0 : index
    %c0_18 = arith.constant 0 : index
    %33 = vector.load %arg5[%c0_17, %c0_18] : memref<4x8xf32, #tpu.memory_space<vmem>>, vector<4x8xf32>
    tpu.vector_store %arg5[%c0_17, %c0_18], %32 {strides = array<i32>} : memref<4x8xf32, #tpu.memory_space<vmem>>, vector<4x8xf32>,
    return
  }
  func.func @transform_0(%arg0: i32) -> (i32, i32) {
    %c0_i32 = arith.constant 0 : i32
    %c0_i32_0 = arith.constant 0 : i32
    return %arg0, %c0_i32 : i32, i32
  }
  func.func @transform_1(%arg0: i32) -> (i32, i32, i32) {
    %c0_i32 = arith.constant 0 : i32
    %c0_i32_0 = arith.constant 0 : i32
    %c0_i32_1 = arith.constant 0 : i32
    return %arg0, %c0_i32, %c0_i32_0 : i32, i32, i32
  }
  func.func @transform_2(%arg0: i32) -> (i32, i32) {
    %c0_i32 = arith.constant 0 : i32
    %c0_i32_0 = arith.constant 0 : i32
    return %arg0, %c0_i32 : i32, i32
  }
  func.func @transform_3(%arg0: i32) -> (i32, i32) {
    %c0_i32 = arith.constant 0 : i32
    %c0_i32_0 = arith.constant 0 : i32
    %c0_i32_1 = arith.constant 0 : i32
    return %c0_i32, %c0_i32_0 : i32, i32
  }
  func.func @transform_4(%arg0: i32) -> (i32, i32) {
    %c0_i32 = arith.constant 0 : i32
    %c0_i32_0 = arith.constant 0 : i32
    return %arg0, %c0_i32 : i32, i32
  }
}

</mosaic_0001>

<bundles_post_ra>
// kernel: tpu_custom_call.1
= control target key start
LH: loop header
LB: loop body
LE: loop exit
PB: predicated region body
PF: predicated region fallthrough
CT: control target
= control target key end

     0   :  { %9 = vsyncpa [#allocation3], 0  ;;  %s502_s0 = inlined_call_operand.hbm [shape: f32[4,32], index: 0, kind: input, shape index: {}]   ;;  %s503_s1 = inlined_call_operand.hbm [shape: f32[4,8,32], index: 1, kind: input, shape index: {}]   ;;  %s504_s2 = inlined_call_operand.vmem [shape: f32[4,8], index: 2, kind: input, shape index: {}]   ;;  %s505_s3 = inlined_call_operand.hbm [shape: f32[32,32], index: 3, kind: input, shape index: {}]   ;;  %s506_s4 = inlined_call_operand.hbm [shape: f32[4,8], index: 4, kind: output, shape index: {}]  }
   0x1   :  { %10 = vsyncpa [#allocation6], 0 }
   0x2   :  { %11 = vsyncpa [#allocation4], 0  ;;  %s401_s15 = smov [#allocation5]   ;;  %s307_s19 = scalar_lea.hbm %s503_s1, 512 }
   0x3   :  { %s27_s16 = sshll.u32 %s401_s15, 4  ;;  %p308_p0 = scmp.ne.s32.totalorder %s503_s1, %s307_s19  ;;  %s28_s16 = int_to_ptr.vmem [resolvable:$true] %s27_s16 }
   0x4   :  { %p311_p1 = scmp.lt.u32.totalorder %s307_s19, %s503_s1 }
   0x6   :  { %p313_p2 = pnand %p311_p1, %p308_p0 }
   0x8   :  { %316 = shalt.err (!%p313_p2)
}
   0x9   :  { %s317_s24 = scalar_lea.vmem %s28_s16, 512  ;;  %p322_p4 = scmp.lt.s32.totalorder %s28_s16, %s28_s16 }
   0xa   :  { %p318_p3 = scmp.ne.s32.totalorder %s28_s16, %s317_s24  ;;  %p323_p5 = scmp.lt.s32.totalorder %s317_s24, %s317_s24 }
   0xc   :  { %p324_p6 = por %p323_p5, %p322_p4 }
   0xe   :  { %p325_p7 = pnand %p324_p6, %p318_p3 }
  0x10   :  { %328 = shalt.err (!%p325_p7)
}
  0x11   :  { %s402_s25 = smov 128   ;;  %s403_s26 = smov 8  }
  0x12   :  { %33 = dma.hbm_to_vmem [thread:$0]  %s503_s1, 512, %s28_s16, [#allocation6], %s402_s25, %s402_s25, %s403_s26  }
  0x13   :  { %s404_s29 = smov [#allocation2]   ;;  %s405_s5 = smov [#allocation7]  }
  0x14   :  { %s18_s30 = sshll.u32 %s404_s29, 4  ;;  %s41_s6 = sshll.u32 %s405_s5, 4  ;;  %s19_s30 = int_to_ptr.vmem [resolvable:$true] %s18_s30  ;;  %s42_s6 = int_to_ptr.vmem [resolvable:$true] %s41_s6 }
  0x15   :  { %s329_s9 = scalar_lea.hbm %s502_s0, 64 }
  0x16   :  { %p330_p8 = scmp.ne.s32.totalorder %s502_s0, %s329_s9  ;;  %p333_p9 = scmp.lt.u32.totalorder %s329_s9, %s502_s0 }
  0x18   :  { %p335_p10 = pnand %p333_p9, %p330_p8 }
  0x1a   :  { %338 = shalt.err (!%p335_p10)
}
  0x1b   :  { %s339_s1 = scalar_lea.vmem %s19_s30, 64  ;;  %p344_p12 = scmp.lt.s32.totalorder %s19_s30, %s19_s30 }
  0x1c   :  { %p340_p11 = scmp.ne.s32.totalorder %s19_s30, %s339_s1  ;;  %p345_p13 = scmp.lt.s32.totalorder %s339_s1, %s339_s1 }
  0x1e   :  { %p346_p0 = por %p345_p13, %p344_p12 }
  0x20   :  { %p347_p1 = pnand %p346_p0, %p340_p11 }
  0x22   :  { %350 = shalt.err (!%p347_p1)
}
  0x23   :  { %21 = dma.hbm_to_vmem [thread:$0]  %s502_s0, 64, %s19_s30, [#allocation3]  }
  0x24   :  { %s351_s18 = scalar_lea.hbm %s505_s3, 512 }
  0x25   :  { %p352_p2 = scmp.ne.s32.totalorder %s505_s3, %s351_s18  ;;  %p355_p3 = scmp.lt.u32.totalorder %s351_s18, %s505_s3 }
  0x27   :  { %p357_p4 = pnand %p355_p3, %p352_p2 }
  0x29   :  { %360 = shalt.err (!%p357_p4)
}
  0x2a   :  { %s361_s23 = scalar_lea.vmem %s42_s6, 512  ;;  %p366_p6 = scmp.lt.s32.totalorder %s42_s6, %s42_s6 }
  0x2b   :  { %p362_p5 = scmp.ne.s32.totalorder %s42_s6, %s361_s23  ;;  %p367_p7 = scmp.lt.s32.totalorder %s361_s23, %s361_s23 }
  0x2d   :  { %p368_p8 = por %p367_p7, %p366_p6 }
  0x2f   :  { %p369_p9 = pnand %p368_p8, %p362_p5 }
  0x31   :  { %372 = shalt.err (!%p369_p9)
}
  0x32   :  { %47 = dma.hbm_to_vmem [thread:$0]  %s505_s3, 512, %s42_s6, [#allocation6], %s402_s25, %s402_s25, %s403_s26  }
  0x33   :  { %395 = dma.done.wait [#allocation3], 64  }
  0x34   :  { %396 = vsyncadd [#allocation3], 4294967232 }
  0x35   :  { %397 = dma.done.wait [#allocation6], 1024  }
  0x36   :  { %398 = vsyncadd [#allocation6], 4294966272  ;;  %v406_v0 = vmov 0.0|0.0   ;;  %vm407_vm0 = vmmov 0   ;;  %v408_v1 = vmov 0.0   ;;  %v63_v2 = vld [vmem:[#allocation7] sm:$0xff]  ;;  %v145_v9 = vlaneseq }
  0x37   :  { %287 = vmatprep.subr.bf16.mxu0 %v406_v0  ;;  %284 = vmatprep.mubr.msk.f32.mxu0 %vm407_vm0, %v408_v1  ;;  %v64_v3 = vld [vmem:[#allocation7 + $0x8] sm:$0xff]  ;;  %v65_v4 = vld [vmem:[#allocation7 + $0x10] sm:$0xff]  ;;  %v66_v6 = vld [vmem:[#allocation7 + $0x18] sm:$0xff]  ;;  %vm67_vm1 = vcmask 261120   ;;  %v409_v13 = vmov 1966171168  }
  0x38   :  { %v288_v5 = vpack.c.bf16 %v64_v3, %v63_v2  ;;  %v291_v7 = vpack.c.bf16 %v66_v6, %v65_v4  ;;  %v57_v8 = vld [vmem:[#allocation2] sm:$0xf]  ;;  %v146_v10 = vshrl.u32 %v145_v9, 7  ;;  %v208_v11 = vand.u32 127, %v145_v9  ;;  %v58_v23 = vld [vmem:[#allocation5] sm:$0xff]  ;;  %v60_v27 = vld [vmem:[#allocation5 + $0x10] sm:$0xff] }
  0x39   :  { %v143_v14 = vunpack.c.l.s4 %v409_v13  ;;  %v59_v28 = vld [vmem:[#allocation5 + $0x8] sm:$0xff]  ;;  %v61_v33 = vld [vmem:[#allocation5 + $0x18] sm:$0xff]  ;;  %vm225_vm2 = vcmask 1041409   ;;  %vm227_vm3 = vcmask 1042434   ;;  %vm229_vm4 = vcmask 1043459  }
  0x3a   :  { %289 = vmatpush3.bf16.msra.mxu0 %v288_v5  ;;  %v211_v12 = vsub.s32 %v208_v11, %v146_v10  ;;  %v168_v20 = vsub.s32 0, %v146_v10  ;;  %v62_v45 = vld [vmem:[%s504_s2] sm:$0xf]  ;;  %vm233_vm6 = vcmask 60416   ;;  %s410_s2 = smov [#allocation8]  }
  0x3b   :  { %290 = vmatprep.subr.bf16.mxu0 %v406_v0  ;;  %v144_v15 = vunpack.c.0.s8 %v143_v14  ;;  %vm202_vm5 = vcmp.ne.f32.partialorder %v62_v45, 0.0  ;;  %s260_s26 = sshll.u32 %s410_s2, 4  ;;  %s261_s26 = int_to_ptr.vmem [resolvable:$true] %s260_s26 }
  0x3c   :  { %s373_s27 = scalar_lea.vmem %s261_s26, 64  ;;  %p378_p11 = scmp.lt.s32.totalorder %s261_s26, %s261_s26 }
  0x3d   :  { %v147_v16 = vsub.s32 %v144_v15, %v146_v10  ;;  %p374_p10 = scmp.ne.s32.totalorder %s261_s26, %s373_s27  ;;  %p379_p12 = scmp.lt.s32.totalorder %s373_s27, %s373_s27 }
  0x3e   :  { %292 = vmatpush3.bf16.msra.mxu0 %v291_v7 }
  0x3f   :  { %p380_p13 = por %p379_p12, %p378_p11 }
  0x41   :  { %285 = vmatmul.mubr.msk.f32.vlgmr.msra.gmra.mrb[0].mxu0 %vm67_vm1, %v57_v8  ;;  %p381_p0 = pnand %p380_p13, %p374_p10 }
 0x114   :  { %v137_v17 = vpop.f32.mrb[0].mxu0 }
 0x115   :  { %v148_v18 = vrot.slane %v137_v17, %v147_v16  ;;  %v286_v19 = vpop.f32.mrb[1].mxu0 }
 0x117   :  { %v149_v21 = vcombine.high %v148_v18, %v148_v18  ;;  %v156_v22 = vrot.slane %v148_v18, %v147_v16 }
 0x119   :  { %v163_v24 = vrot.slane %v149_v21, %v147_v16  ;;  %v164_v25 = vcombine.high %v156_v22, %v156_v22  ;;  %v169_v26 = vrot.slane %v156_v22, %v168_v20 }
 0x11b   :  { %v186_v29 = vmul.f32 %v169_v26, %v58_v23  ;;  %v177_v30 = vrot.slane %v164_v25, %v168_v20  ;;  %v173_v31 = vrot.slane %v163_v24, %v168_v20  ;;  %v165_v32 = vcombine.high %v163_v24, %v163_v24 }
 0x11d   :  { %v190_v34 = vsel %vm67_vm1, %v186_v29, 0.0  ;;  %v188_v35 = vmul.f32 %v177_v30, %v60_v27  ;;  %v187_v36 = vmul.f32 %v173_v31, %v59_v28  ;;  %v181_v37 = vrot.slane %v165_v32, %v168_v20 }
 0x11e   :  { %191 = vadd.xlane.f32.xlu0 %v190_v34 }
 0x11f   :  { %v196_v38 = vsel %vm67_vm1, %v188_v35, 0.0  ;;  %v189_v39 = vmul.f32 %v181_v37, %v61_v33  ;;  %v193_v40 = vsel %vm67_vm1, %v187_v36, 0.0 }
 0x120   :  { %197 = vadd.xlane.f32.xlu1 %v196_v38 }
 0x121   :  { %v199_v41 = vsel %vm67_vm1, %v189_v39, 0.0 }
 0x122   :  { %194 = vadd.xlane.f32.xlu0 %v193_v40 }
 0x124   :  { %200 = vadd.xlane.f32.xlu1 %v199_v41 }
 0x1ab   :  { %v192_v42 = vpop.xlane.xlu0 %191 }
 0x1ac   :  { %v212_v46 = vrot.slane %v192_v42, %v211_v12 }
 0x1ad   :  { %v198_v43 = vpop.xlane.xlu1 %197 }
 0x1ae   :  { %v220_v48 = vrot.slane %v198_v43, %v211_v12 }
 0x1af   :  { %v195_v44 = vpop.xlane.xlu0 %194 }
 0x1b0   :  { %v216_v47 = vrot.slane %v195_v44, %v211_v12 }
 0x1b1   :  { %v201_v49 = vpop.xlane.xlu1 %200 }
 0x1b2   :  { %v226_v50 = vsel %vm225_vm2, %v216_v47, %v212_v46  ;;  %v224_v51 = vrot.slane %v201_v49, %v211_v12 }
 0x1b3   :  { %v228_v52 = vsel %vm227_vm3, %v220_v48, %v226_v50 }
 0x1b4   :  { %v230_v53 = vsel %vm229_vm4, %v224_v51, %v228_v52 }
 0x1b5   :  { %v232_v54 = vsel %vm202_vm5, -1e+10, %v230_v53 }
 0x1b6   :  { %v234_v55 = vsel %vm233_vm6, %v232_v54, -inf }
 0x1b7   :  { %235 = vmax.xlane.f32.xlu0 %v234_v55 }
 0x244   :  { %v236_v56 = vpop.xlane.xlu0 %235 }
 0x245   :  { %v237_v57 = vsub.f32 %v232_v54, %v236_v56 }
 0x247   :  { %v238_v58 = vmul.f32 1.442695, %v237_v57 }
 0x249   :  { %303 = vpow2.f32 %v238_v58 }
 0x253   :  { %v304_v59 = vpop.eup %303 }
 0x254   :  { %v240_v60 = vsel %vm233_vm6, %v304_v59, 0.0 }
 0x255   :  { %241 = vadd.xlane.f32.xlu1 %v240_v60 }
 0x2e2   :  { %v242_v61 = vpop.xlane.xlu1 %241 }
 0x2e3   :  { %305 = vrcp.f32 %v242_v61 }
 0x2ed   :  { %v306_v62 = vpop.eup %305 }
 0x2ee   :  { %v244_v63 = vmul.f32 %v306_v62, %v304_v59 }
 0x2f0   :  { %v245_v0 = vsel %vm233_vm6, %v244_v63, 0.0 }
 0x2f1   :  { %246 = vadd.xlane.f32.xlu0 %v245_v0 }
 0x37e   :  { %v247_v1 = vpop.xlane.xlu0 %246 }
 0x37f   :  { %v249_v2 = vmul.f32 0.125, %v247_v1 }
 0x381   :  { %v250_v3 = vmul.f32 0.2, %v249_v2 }
 0x383   :  { %vm251_vm7 = vcmp.lt.f32.partialorder %v244_v63, %v250_v3 }
 0x384   :  { %v252_v4 = vsel %vm251_vm7, 1.0, %v62_v45 }
 0x385   :  { %253 = vst.msk [vmem:[#allocation8] sm:$0xf] %vm233_vm6, %v252_v4 }
 0x386   :  { %384 = shalt.err (!%p381_p0)
}
 0x387   :  { %s385_s30 = scalar_lea.hbm %s506_s4, 64 }
 0x388   :  { %p386_p1 = scmp.ne.s32.totalorder %s506_s4, %s385_s30  ;;  %p389_p2 = scmp.lt.u32.totalorder %s385_s30, %s506_s4 }
 0x38a   :  { %p391_p3 = pnand %p389_p2, %p386_p1 }
 0x38c   :  { %394 = shalt.err (!%p391_p3)
}
 0x38d   :  { %263 = dma.vmem_to_hbm [thread:$0]  %s261_s26, 64, %s506_s4, [#allocation4]  }
 0x38e   :  { %399 = dma.done.wait [#allocation4], 64  }
 0x38f   :  { %400 = vsyncadd [#allocation4], 4294967232 }
 0x390   :  { %267 = vsyncpa [#allocation3], 1 }
 0x391   :  { %268 = vsyncpa [#allocation6], 1 }
 0x392   :  { %269 = vsyncpa [#allocation4], 1 }

</bundles_post_ra>
